<compile_context>
chip_gen: v7x
topology: tpu7x:2x2x1
jax: 0.10.0
libtpu: 0.0.40
codegen_flags: <defaults>
</compile_context>

<pallas_src>
import functools

import numpy as np
import jax
import jax.numpy as jnp
from jax import lax
from jax.experimental import pallas as pl
from jax.experimental.pallas import tpu as pltpu

HID = 32          # hid_dim
N_HEADS = 4
HEAD_DIM = HID // N_HEADS
PF_DIM = 64       # pf_dim
OUT_DIM = 16      # output_dim
N_LAYERS = 2
BATCH = 8
EPS = 1e-5        # nn.LayerNorm default eps
LANES = 128       # lane width of the packed weight slab / padded output

# ---- packed weight-slab layout (all sections start on 8-row boundaries) -------------
# per layer (LAYER_ROWS rows):
#   [            0 :          HID)  w_trg  (HID, HID)    cols [0:HID)
#   [          HID :        2*HID)  w_enc  (HID, HID)    cols [0:HID)
#   [        2*HID :        3*HID)  w_pf1  (HID, PF_DIM) cols [0:PF_DIM)
#   [        3*HID : 3*HID+PF_DIM)  w_pf2  (PF_DIM, HID) cols [0:HID)
#   [ 3*HID+PF_DIM : +8)            rows: +0 b_h, +1 ln_g, +2 ln_b, +3 b_pf1, +4 b_pf2
# tail (TAIL_ROWS rows, after n_layers * LAYER_ROWS):
#   [0:HID)  w_out zero-padded to (HID, LANES)
#   [HID]    b_out zero-padded to LANES lanes
LAYER_ROWS = 3 * HID + PF_DIM + 8      # 168
TAIL_ROWS = HID + 8                    # 40


def _fused_forward_kernel(trg_ref, enc_ref, w_ref, out_ref, *, n_layers):
    trg = trg_ref[...]
    enc = enc_ref[...]
    inv_h = jnp.float32(1.0 / HID)
    ones_col = jnp.ones((HID, 1), jnp.float32)   # hoisted MXU-reduction vector

    def layer_norm(x, gamma, beta):
        # Cross-lane reductions on the (idle) MXU instead of the XLU; rsqrt goes to EUP.
        s1 = jnp.dot(x, ones_col, preferred_element_type=jnp.float32)        # (bm, 1)
        s2 = jnp.dot(x * x, ones_col, preferred_element_type=jnp.float32)    # (bm, 1)
        mu = s1 * inv_h
        var = s2 * inv_h - mu * mu
        return (x - mu) * lax.rsqrt(var + EPS) * gamma + beta

    for l in range(n_layers):                      # static python loop -> fully unrolled
        base = l * LAYER_ROWS                      # static offsets -> zero-cost ref slices
        w_trg = w_ref[base + 0:base + HID, 0:HID]
        w_enc = w_ref[base + HID:base + 2 * HID, 0:HID]
        w_pf1 = w_ref[base + 2 * HID:base + 3 * HID, 0:PF_DIM]
        w_pf2 = w_ref[base + 3 * HID:base + 3 * HID + PF_DIM, 0:HID]
        vbase = base + 3 * HID + PF_DIM
        b_h = w_ref[vbase + 0:vbase + 1, 0:HID]
        ln_g = w_ref[vbase + 1:vbase + 2, 0:HID]
        ln_b = w_ref[vbase + 2:vbase + 3, 0:HID]
        b_pf1 = w_ref[vbase + 3:vbase + 4, 0:PF_DIM]
        b_pf2 = w_ref[vbase + 4:vbase + 5, 0:HID]

        # h = relu(cat(attn1(trg,enc,enc), attn2(enc,trg,trg)) @ Wfc + bfc), folded.
        h = jnp.dot(trg, w_trg, preferred_element_type=jnp.float32)
        h = h + jnp.dot(enc, w_enc, preferred_element_type=jnp.float32)
        h = jnp.maximum(h + b_h, 0.0)

        t1 = layer_norm(trg + h, ln_g, ln_b)       # trg.unsqueeze(1)+..., then LN

        ff = jnp.maximum(
            jnp.dot(t1, w_pf1, preferred_element_type=jnp.float32) + b_pf1, 0.0)
        ff = jnp.dot(ff, w_pf2, preferred_element_type=jnp.float32) + b_pf2

        trg = layer_norm(t1 + ff, ln_g, ln_b)      # second LN (same gamma/beta, as in torch)

    tail = n_layers * LAYER_ROWS
    w_out = w_ref[tail:tail + HID, :]              # (HID, 128), lane-dense (zero-padded cols)
    b_out = w_ref[tail + HID:tail + HID + 1, :]    # (1, 128)
    out_ref[...] = jnp.dot(trg, w_out, preferred_element_type=jnp.float32) + b_out


def _round_up(x, m):
    return ((x + m - 1) // m) * m


def drug_cell_attention(trg, enc_src, slab, trg_mask=None, src_mask=None):
    # Masks accepted for API parity only: with length-1 sequences the softmax over a single
    # key is 1 regardless of the mask, so they cannot change the output.
    del trg_mask, src_mask
    if trg.ndim != 2 or enc_src.ndim != 2:
        raise ValueError(
            "algebraic MHA fold assumes length-1 sequences: trg/enc_src must be (B, hid_dim)")
    B, H = trg.shape
    assert H == HID and enc_src.shape == (B, HID)
    n_layers = (slab.shape[0] - TAIL_ROWS) // LAYER_ROWS

    # Batch tile: large to amortize per-grid-step overhead, capped so double-buffered
    # activation blocks stay far below v7x's 64 MiB VMEM; for large B ensure >=2 "parallel"
    # steps so v7x's second TensorCore gets work (no-op on v5e/v6e and at B=8).
    bm = min(_round_up(B, 8), 4096)
    if B > 8 and pl.cdiv(B, bm) < 2:
        bm = max(8, _round_up(pl.cdiv(B, 2), 8))
    grid = (pl.cdiv(B, bm),)

    row_spec = pl.BlockSpec((bm, HID), lambda i: (i, 0))
    slab_spec = pl.BlockSpec(slab.shape, lambda i: (0, 0))   # constant block -> fetched once

    out_padded = pl.pallas_call(
        functools.partial(_fused_forward_kernel, n_layers=n_layers),
        out_shape=jax.ShapeDtypeStruct((B, LANES), jnp.float32),
        grid=grid,
        in_specs=[row_spec, row_spec, slab_spec],
        out_specs=pl.BlockSpec((bm, LANES), lambda i: (i, 0)),
        compiler_params=pltpu.CompilerParams(
            dimension_semantics=("parallel",),
            vmem_limit_bytes=48 * 1024 * 1024,   # headroom under v7x's 64 MiB physical VMEM
        ),
    )(trg, enc_src, slab)
    return out_padded[:, :OUT_DIM], None   # last layer's `attention` is None in the torch code


def fold_and_pack_params(params):
    """Host-side exact algebraic fold (seq_len == 1) of each layer's two MHAs + fc, packed
    into a single lane-dense (R, 128) f32 slab.  Fold is done in float64 to avoid drift."""
    def np64(x):
        return np.asarray(x, dtype=np.float64)

    n_layers = len(params["layers"])
    rows = n_layers * LAYER_ROWS + TAIL_ROWS
    slab = np.zeros((rows, LANES), dtype=np.float64)

    for l, p in enumerate(params["layers"]):
        wv1, wo1 = np64(p["w_mha1"][2]), np64(p["w_mha1"][3])
        bv1, bo1 = np64(p["b_mha1"][2]), np64(p["b_mha1"][3])
        wv2, wo2 = np64(p["w_mha2"][2]), np64(p["w_mha2"][3])
        bv2, bo2 = np64(p["b_mha2"][2]), np64(p["b_mha2"][3])
        # softmax over one key == 1  =>  MHA(q, kv, kv) == kv @ Wv @ Wo + (bv @ Wo + bo)
        a1_w, a1_b = wv1 @ wo1, bv1 @ wo1 + bo1    # attn1(trg, enc, enc): linear in enc
        a2_w, a2_b = wv2 @ wo2, bv2 @ wo2 + bo2    # attn2(enc, trg, trg): linear in trg
        w_fc = np64(p["w_fc"])
        wfc_top, wfc_bot = w_fc[:HID], w_fc[HID:]
        w_enc = a1_w @ wfc_top
        w_trg = a2_w @ wfc_bot
        b_h = a1_b @ wfc_top + a2_b @ wfc_bot + np64(p["b_fc"])

        base = l * LAYER_ROWS
        slab[base:base + HID, :HID] = w_trg
        slab[base + HID:base + 2 * HID, :HID] = w_enc
        slab[base + 2 * HID:base + 3 * HID, :PF_DIM] = np64(p["w_pf1"])
        slab[base + 3 * HID:base + 3 * HID + PF_DIM, :HID] = np64(p["w_pf2"])
        vbase = base + 3 * HID + PF_DIM
        slab[vbase + 0:vbase + 1, :HID] = b_h
        slab[vbase + 1:vbase + 2, :HID] = np64(p["ln_g"])
        slab[vbase + 2:vbase + 3, :HID] = np64(p["ln_b"])
        slab[vbase + 3:vbase + 4, :PF_DIM] = np64(p["b_pf1"])
        slab[vbase + 4:vbase + 5, :HID] = np64(p["b_pf2"])

    tail = n_layers * LAYER_ROWS
    slab[tail:tail + HID, :OUT_DIM] = np64(params["w_out"])
    slab[tail + HID:tail + HID + 1, :OUT_DIM] = np64(params["b_out"])
    return jnp.asarray(slab.astype(np.float32))


def init_params(key):
    state = {"key": key}

    def nxt():
        state["key"], sub = jax.random.split(state["key"])
        return sub

    def dense(shape, scale=0.1):
        return (scale * jax.random.normal(nxt(), shape)).astype(jnp.float32)

    layers = []
    for _ in range(N_LAYERS):
        layers.append(dict(
            w_mha1=dense((4, HID, HID)), b_mha1=dense((4, 1, HID)),   # [Wq,Wk,Wv,Wo]
            w_mha2=dense((4, HID, HID)), b_mha2=dense((4, 1, HID)),
            w_fc=dense((2 * HID, HID)), b_fc=dense((1, HID)),
            ln_g=jnp.ones((1, HID), jnp.float32),
            ln_b=jnp.zeros((1, HID), jnp.float32),
            w_pf1=dense((HID, PF_DIM)), b_pf1=dense((1, PF_DIM)),
            w_pf2=dense((PF_DIM, HID)), b_pf2=dense((1, HID)),
        ))
    return dict(layers=layers,
                w_out=dense((HID, OUT_DIM)), b_out=dense((1, OUT_DIM)))


def reference_forward(trg, enc, params):
    """Pure-JAX mirror of the PyTorch forward (eval mode, un-folded graph, full MHA path)."""
    def mha(q_in, kv_in, w, b):
        B = q_in.shape[0]
        q = (q_in @ w[0] + b[0]).reshape(B, 1, N_HEADS, HEAD_DIM).transpose(0, 2, 1, 3)
        k = (kv_in @ w[1] + b[1]).reshape(B, 1, N_HEADS, HEAD_DIM).transpose(0, 2, 1, 3)
        v = (kv_in @ w[2] + b[2]).reshape(B, 1, N_HEADS, HEAD_DIM).transpose(0, 2, 1, 3)
        energy = jnp.einsum("bhqd,bhkd->bhqk", q, k) / jnp.sqrt(float(HEAD_DIM))
        attn = jax.nn.softmax(energy, axis=-1)          # single key -> exactly 1 (mask no-op)
        ctx = jnp.einsum("bhqk,bhkd->bhqd", attn, v)
        ctx = ctx.transpose(0, 2, 1, 3).reshape(B, HID)
        return ctx @ w[3] + b[3]

    def lnorm(x, g, bta):
        mu = x.mean(-1, keepdims=True)
        var = ((x - mu) ** 2).mean(-1, keepdims=True)
        return (x - mu) / jnp.sqrt(var + EPS) * g + bta

    for p in params["layers"]:
        te = mha(trg, enc, p["w_mha1"], p["b_mha1"])
        td = mha(enc, trg, p["w_mha2"], p["b_mha2"])
        h = jax.nn.relu(jnp.concatenate([te, td], -1) @ p["w_fc"] + p["b_fc"])
        t1 = lnorm(trg + h, p["ln_g"], p["ln_b"])
        ff = jax.nn.relu(t1 @ p["w_pf1"] + p["b_pf1"]) @ p["w_pf2"] + p["b_pf2"]
        trg = lnorm(t1 + ff, p["ln_g"], p["ln_b"])
    return trg @ params["w_out"] + params["b_out"], None


if __name__ == "__main__":
    key = jax.random.PRNGKey(0)
    k_par, k_trg, k_enc = jax.random.split(key, 3)
    params = init_params(k_par)
    trg = jax.random.normal(k_trg, (BATCH, HID), jnp.float32)      # cell embedding
    enc_src = jax.random.normal(k_enc, (BATCH, HID), jnp.float32)  # drug embedding

    slab = fold_and_pack_params(params)
    out, attn = drug_cell_attention(trg, enc_src, slab, trg_mask=None, src_mask=None)
    out = jax.block_until_ready(out)

    with jax.default_matmul_precision("highest"):
        ref, _ = reference_forward(trg, enc_src, params)

    assert out.shape == (BATCH, OUT_DIM)
    assert attn is None
    assert jnp.allclose(out, ref, atol=1e-3, rtol=1e-3), \
        float(jnp.max(jnp.abs(out - ref)))
    print("KERNEL_OK")
</pallas_src>

<mosaic_0001>
module attributes {stable_mosaic.version = 11 : i64} {
  func.func @_fused_forward_kernel(%arg0: i32, %arg1: memref<8x32xf32, #tpu.memory_space<vmem>>, %arg2: memref<8x32xf32, #tpu.memory_space<vmem>>, %arg3: memref<376x128xf32, #tpu.memory_space<vmem>>, %arg4: memref<8x128xf32, #tpu.memory_space<vmem>>) attributes {dimension_semantics = [#tpu.dimension_semantics<parallel>], iteration_bounds = array<i64: 1>, scalar_prefetch = 0 : i64, scratch_operands = 0 : i64, tpu.core_type = #tpu.core_type<tc>, window_params = [{transform_indices = @transform_0, window_bounds = array<i64: 8, 32>}, {transform_indices = @transform_1, window_bounds = array<i64: 8, 32>}, {pipeline_mode = #tpu.pipeline_mode<synchronous>, transform_indices = @transform_2, window_bounds = array<i64: 376, 128>}, {transform_indices = @transform_3, window_bounds = array<i64: 8, 128>}]} {
    %c0 = arith.constant 0 : index
    %c0_0 = arith.constant 0 : index
    %0 = vector.load %arg1[%c0, %c0_0] : memref<8x32xf32, #tpu.memory_space<vmem>>, vector<8x32xf32>
    %c0_1 = arith.constant 0 : index
    %c0_2 = arith.constant 0 : index
    %1 = vector.load %arg2[%c0_1, %c0_2] : memref<8x32xf32, #tpu.memory_space<vmem>>, vector<8x32xf32>
    %cst = arith.constant 1.000000e+00 : f32
    %2 = vector.broadcast %cst : f32 to vector<32x1xf32>
    %c0_3 = arith.constant 0 : index
    %c0_4 = arith.constant 0 : index
    %3 = vector.load %arg3[%c0_3, %c0_4] : memref<376x128xf32, #tpu.memory_space<vmem>>, vector<32x32xf32>
    %c32 = arith.constant 32 : index
    %c0_5 = arith.constant 0 : index
    %4 = vector.load %arg3[%c32, %c0_5] : memref<376x128xf32, #tpu.memory_space<vmem>>, vector<32x32xf32>
    %c64 = arith.constant 64 : index
    %c0_6 = arith.constant 0 : index
    %5 = vector.load %arg3[%c64, %c0_6] : memref<376x128xf32, #tpu.memory_space<vmem>>, vector<32x64xf32>
    %c96 = arith.constant 96 : index
    %c0_7 = arith.constant 0 : index
    %6 = vector.load %arg3[%c96, %c0_7] : memref<376x128xf32, #tpu.memory_space<vmem>>, vector<64x32xf32>
    %c160 = arith.constant 160 : index
    %c0_8 = arith.constant 0 : index
    %7 = vector.load %arg3[%c160, %c0_8] : memref<376x128xf32, #tpu.memory_space<vmem>>, vector<1x32xf32>
    %c161 = arith.constant 161 : index
    %c0_9 = arith.constant 0 : index
    %8 = vector.load %arg3[%c161, %c0_9] : memref<376x128xf32, #tpu.memory_space<vmem>>, vector<1x32xf32>
    %c162 = arith.constant 162 : index
    %c0_10 = arith.constant 0 : index
    %9 = vector.load %arg3[%c162, %c0_10] : memref<376x128xf32, #tpu.memory_space<vmem>>, vector<1x32xf32>
    %c163 = arith.constant 163 : index
    %c0_11 = arith.constant 0 : index
    %10 = vector.load %arg3[%c163, %c0_11] : memref<376x128xf32, #tpu.memory_space<vmem>>, vector<1x64xf32>
    %c164 = arith.constant 164 : index
    %c0_12 = arith.constant 0 : index
    %11 = vector.load %arg3[%c164, %c0_12] : memref<376x128xf32, #tpu.memory_space<vmem>>, vector<1x32xf32>
    %cst_13 = arith.constant dense<0.000000e+00> : vector<8x32xf32>
    %12 = tpu.matmul %0, %3, %cst_13 {dimension_numbers = #tpu.dot_dimension_numbers<[1], [0], [0], [1], [0, 0, 1, 1], [], []>} : vector<8x32xf32>, vector<32x32xf32>, vector<8x32xf32> -> vector<8x32xf32>
    %cst_14 = arith.constant dense<0.000000e+00> : vector<8x32xf32>
    %13 = tpu.matmul %1, %4, %cst_14 {dimension_numbers = #tpu.dot_dimension_numbers<[1], [0], [0], [1], [0, 0, 1, 1], [], []>} : vector<8x32xf32>, vector<32x32xf32>, vector<8x32xf32> -> vector<8x32xf32>
    %14 = arith.addf %12, %13 : vector<8x32xf32>
    %15 = vector.broadcast %7 : vector<1x32xf32> to vector<8x32xf32>
    %16 = arith.addf %14, %15 : vector<8x32xf32>
    %cst_15 = arith.constant 0.000000e+00 : f32
    %17 = vector.broadcast %cst_15 : f32 to vector<8x32xf32>
    %18 = arith.maximumf %16, %17 : vector<8x32xf32>
    %19 = arith.addf %0, %18 : vector<8x32xf32>
    %cst_16 = arith.constant dense<0.000000e+00> : vector<8x1xf32>
    %20 = tpu.matmul %19, %2, %cst_16 {dimension_numbers = #tpu.dot_dimension_numbers<[1], [0], [0], [1], [0, 0, 1, 1], [], []>} : vector<8x32xf32>, vector<32x1xf32>, vector<8x1xf32> -> vector<8x1xf32>
    %21 = arith.mulf %19, %19 : vector<8x32xf32>
    %cst_17 = arith.constant dense<0.000000e+00> : vector<8x1xf32>
    %22 = tpu.matmul %21, %2, %cst_17 {dimension_numbers = #tpu.dot_dimension_numbers<[1], [0], [0], [1], [0, 0, 1, 1], [], []>} : vector<8x32xf32>, vector<32x1xf32>, vector<8x1xf32> -> vector<8x1xf32>
    %cst_18 = arith.constant 3.125000e-02 : f32
    %23 = vector.broadcast %cst_18 : f32 to vector<8x1xf32>
    %24 = arith.mulf %20, %23 : vector<8x1xf32>
    %cst_19 = arith.constant 3.125000e-02 : f32
    %25 = vector.broadcast %cst_19 : f32 to vector<8x1xf32>
    %26 = arith.mulf %22, %25 : vector<8x1xf32>
    %27 = arith.mulf %24, %24 : vector<8x1xf32>
    %28 = arith.subf %26, %27 : vector<8x1xf32>
    %29 = vector.broadcast %24 : vector<8x1xf32> to vector<8x32xf32>
    %30 = arith.subf %19, %29 : vector<8x32xf32>
    %cst_20 = arith.constant 9.99999974E-6 : f32
    %31 = vector.broadcast %cst_20 : f32 to vector<8x1xf32>
    %32 = arith.addf %28, %31 : vector<8x1xf32>
    %33 = math.rsqrt %32 : vector<8x1xf32>
    %34 = vector.broadcast %33 : vector<8x1xf32> to vector<8x32xf32>
    %35 = arith.mulf %30, %34 : vector<8x32xf32>
    %36 = vector.broadcast %8 : vector<1x32xf32> to vector<8x32xf32>
    %37 = arith.mulf %35, %36 : vector<8x32xf32>
    %38 = vector.broadcast %9 : vector<1x32xf32> to vector<8x32xf32>
    %39 = arith.addf %37, %38 : vector<8x32xf32>
    %cst_21 = arith.constant dense<0.000000e+00> : vector<8x64xf32>
    %40 = tpu.matmul %39, %5, %cst_21 {dimension_numbers = #tpu.dot_dimension_numbers<[1], [0], [0], [1], [0, 0, 1, 1], [], []>} : vector<8x32xf32>, vector<32x64xf32>, vector<8x64xf32> -> vector<8x64xf32>
    %41 = vector.broadcast %10 : vector<1x64xf32> to vector<8x64xf32>
    %42 = arith.addf %40, %41 : vector<8x64xf32>
    %cst_22 = arith.constant 0.000000e+00 : f32
    %43 = vector.broadcast %cst_22 : f32 to vector<8x64xf32>
    %44 = arith.maximumf %42, %43 : vector<8x64xf32>
    %cst_23 = arith.constant dense<0.000000e+00> : vector<8x32xf32>
    %45 = tpu.matmul %44, %6, %cst_23 {dimension_numbers = #tpu.dot_dimension_numbers<[1], [0], [0], [1], [0, 0, 1, 1], [], []>} : vector<8x64xf32>, vector<64x32xf32>, vector<8x32xf32> -> vector<8x32xf32>
    %46 = vector.broadcast %11 : vector<1x32xf32> to vector<8x32xf32>
    %47 = arith.addf %45, %46 : vector<8x32xf32>
    %48 = arith.addf %39, %47 : vector<8x32xf32>
    %cst_24 = arith.constant dense<0.000000e+00> : vector<8x1xf32>
    %49 = tpu.matmul %48, %2, %cst_24 {dimension_numbers = #tpu.dot_dimension_numbers<[1], [0], [0], [1], [0, 0, 1, 1], [], []>} : vector<8x32xf32>, vector<32x1xf32>, vector<8x1xf32> -> vector<8x1xf32>
    %50 = arith.mulf %48, %48 : vector<8x32xf32>
    %cst_25 = arith.constant dense<0.000000e+00> : vector<8x1xf32>
    %51 = tpu.matmul %50, %2, %cst_25 {dimension_numbers = #tpu.dot_dimension_numbers<[1], [0], [0], [1], [0, 0, 1, 1], [], []>} : vector<8x32xf32>, vector<32x1xf32>, vector<8x1xf32> -> vector<8x1xf32>
    %cst_26 = arith.constant 3.125000e-02 : f32
    %52 = vector.broadcast %cst_26 : f32 to vector<8x1xf32>
    %53 = arith.mulf %49, %52 : vector<8x1xf32>
    %cst_27 = arith.constant 3.125000e-02 : f32
    %54 = vector.broadcast %cst_27 : f32 to vector<8x1xf32>
    %55 = arith.mulf %51, %54 : vector<8x1xf32>
    %56 = arith.mulf %53, %53 : vector<8x1xf32>
    %57 = arith.subf %55, %56 : vector<8x1xf32>
    %58 = vector.broadcast %53 : vector<8x1xf32> to vector<8x32xf32>
    %59 = arith.subf %48, %58 : vector<8x32xf32>
    %cst_28 = arith.constant 9.99999974E-6 : f32
    %60 = vector.broadcast %cst_28 : f32 to vector<8x1xf32>
    %61 = arith.addf %57, %60 : vector<8x1xf32>
    %62 = math.rsqrt %61 : vector<8x1xf32>
    %63 = vector.broadcast %62 : vector<8x1xf32> to vector<8x32xf32>
    %64 = arith.mulf %59, %63 : vector<8x32xf32>
    %65 = vector.broadcast %8 : vector<1x32xf32> to vector<8x32xf32>
    %66 = arith.mulf %64, %65 : vector<8x32xf32>
    %67 = vector.broadcast %9 : vector<1x32xf32> to vector<8x32xf32>
    %68 = arith.addf %66, %67 : vector<8x32xf32>
    %c168 = arith.constant 168 : index
    %c0_29 = arith.constant 0 : index
    %69 = vector.load %arg3[%c168, %c0_29] : memref<376x128xf32, #tpu.memory_space<vmem>>, vector<32x32xf32>
    %c200 = arith.constant 200 : index
    %c0_30 = arith.constant 0 : index
    %70 = vector.load %arg3[%c200, %c0_30] : memref<376x128xf32, #tpu.memory_space<vmem>>, vector<32x32xf32>
    %c232 = arith.constant 232 : index
    %c0_31 = arith.constant 0 : index
    %71 = vector.load %arg3[%c232, %c0_31] : memref<376x128xf32, #tpu.memory_space<vmem>>, vector<32x64xf32>
    %c264 = arith.constant 264 : index
    %c0_32 = arith.constant 0 : index
    %72 = vector.load %arg3[%c264, %c0_32] : memref<376x128xf32, #tpu.memory_space<vmem>>, vector<64x32xf32>
    %c328 = arith.constant 328 : index
    %c0_33 = arith.constant 0 : index
    %73 = vector.load %arg3[%c328, %c0_33] : memref<376x128xf32, #tpu.memory_space<vmem>>, vector<1x32xf32>
    %c329 = arith.constant 329 : index
    %c0_34 = arith.constant 0 : index
    %74 = vector.load %arg3[%c329, %c0_34] : memref<376x128xf32, #tpu.memory_space<vmem>>, vector<1x32xf32>
    %c330 = arith.constant 330 : index
    %c0_35 = arith.constant 0 : index
    %75 = vector.load %arg3[%c330, %c0_35] : memref<376x128xf32, #tpu.memory_space<vmem>>, vector<1x32xf32>
    %c331 = arith.constant 331 : index
    %c0_36 = arith.constant 0 : index
    %76 = vector.load %arg3[%c331, %c0_36] : memref<376x128xf32, #tpu.memory_space<vmem>>, vector<1x64xf32>
    %c332 = arith.constant 332 : index
    %c0_37 = arith.constant 0 : index
    %77 = vector.load %arg3[%c332, %c0_37] : memref<376x128xf32, #tpu.memory_space<vmem>>, vector<1x32xf32>
    %cst_38 = arith.constant dense<0.000000e+00> : vector<8x32xf32>
    %78 = tpu.matmul %68, %69, %cst_38 {dimension_numbers = #tpu.dot_dimension_numbers<[1], [0], [0], [1], [0, 0, 1, 1], [], []>} : vector<8x32xf32>, vector<32x32xf32>, vector<8x32xf32> -> vector<8x32xf32>
    %cst_39 = arith.constant dense<0.000000e+00> : vector<8x32xf32>
    %79 = tpu.matmul %1, %70, %cst_39 {dimension_numbers = #tpu.dot_dimension_numbers<[1], [0], [0], [1], [0, 0, 1, 1], [], []>} : vector<8x32xf32>, vector<32x32xf32>, vector<8x32xf32> -> vector<8x32xf32>
    %80 = arith.addf %78, %79 : vector<8x32xf32>
    %81 = vector.broadcast %73 : vector<1x32xf32> to vector<8x32xf32>
    %82 = arith.addf %80, %81 : vector<8x32xf32>
    %cst_40 = arith.constant 0.000000e+00 : f32
    %83 = vector.broadcast %cst_40 : f32 to vector<8x32xf32>
    %84 = arith.maximumf %82, %83 : vector<8x32xf32>
    %85 = arith.addf %68, %84 : vector<8x32xf32>
    %cst_41 = arith.constant dense<0.000000e+00> : vector<8x1xf32>
    %86 = tpu.matmul %85, %2, %cst_41 {dimension_numbers = #tpu.dot_dimension_numbers<[1], [0], [0], [1], [0, 0, 1, 1], [], []>} : vector<8x32xf32>, vector<32x1xf32>, vector<8x1xf32> -> vector<8x1xf32>
    %87 = arith.mulf %85, %85 : vector<8x32xf32>
    %cst_42 = arith.constant dense<0.000000e+00> : vector<8x1xf32>
    %88 = tpu.matmul %87, %2, %cst_42 {dimension_numbers = #tpu.dot_dimension_numbers<[1], [0], [0], [1], [0, 0, 1, 1], [], []>} : vector<8x32xf32>, vector<32x1xf32>, vector<8x1xf32> -> vector<8x1xf32>
    %cst_43 = arith.constant 3.125000e-02 : f32
    %89 = vector.broadcast %cst_43 : f32 to vector<8x1xf32>
    %90 = arith.mulf %86, %89 : vector<8x1xf32>
    %cst_44 = arith.constant 3.125000e-02 : f32
    %91 = vector.broadcast %cst_44 : f32 to vector<8x1xf32>
    %92 = arith.mulf %88, %91 : vector<8x1xf32>
    %93 = arith.mulf %90, %90 : vector<8x1xf32>
    %94 = arith.subf %92, %93 : vector<8x1xf32>
    %95 = vector.broadcast %90 : vector<8x1xf32> to vector<8x32xf32>
    %96 = arith.subf %85, %95 : vector<8x32xf32>
    %cst_45 = arith.constant 9.99999974E-6 : f32
    %97 = vector.broadcast %cst_45 : f32 to vector<8x1xf32>
    %98 = arith.addf %94, %97 : vector<8x1xf32>
    %99 = math.rsqrt %98 : vector<8x1xf32>
    %100 = vector.broadcast %99 : vector<8x1xf32> to vector<8x32xf32>
    %101 = arith.mulf %96, %100 : vector<8x32xf32>
    %102 = vector.broadcast %74 : vector<1x32xf32> to vector<8x32xf32>
    %103 = arith.mulf %101, %102 : vector<8x32xf32>
    %104 = vector.broadcast %75 : vector<1x32xf32> to vector<8x32xf32>
    %105 = arith.addf %103, %104 : vector<8x32xf32>
    %cst_46 = arith.constant dense<0.000000e+00> : vector<8x64xf32>
    %106 = tpu.matmul %105, %71, %cst_46 {dimension_numbers = #tpu.dot_dimension_numbers<[1], [0], [0], [1], [0, 0, 1, 1], [], []>} : vector<8x32xf32>, vector<32x64xf32>, vector<8x64xf32> -> vector<8x64xf32>
    %107 = vector.broadcast %76 : vector<1x64xf32> to vector<8x64xf32>
    %108 = arith.addf %106, %107 : vector<8x64xf32>
    %cst_47 = arith.constant 0.000000e+00 : f32
    %109 = vector.broadcast %cst_47 : f32 to vector<8x64xf32>
    %110 = arith.maximumf %108, %109 : vector<8x64xf32>
    %cst_48 = arith.constant dense<0.000000e+00> : vector<8x32xf32>
    %111 = tpu.matmul %110, %72, %cst_48 {dimension_numbers = #tpu.dot_dimension_numbers<[1], [0], [0], [1], [0, 0, 1, 1], [], []>} : vector<8x64xf32>, vector<64x32xf32>, vector<8x32xf32> -> vector<8x32xf32>
    %112 = vector.broadcast %77 : vector<1x32xf32> to vector<8x32xf32>
    %113 = arith.addf %111, %112 : vector<8x32xf32>
    %114 = arith.addf %105, %113 : vector<8x32xf32>
    %cst_49 = arith.constant dense<0.000000e+00> : vector<8x1xf32>
    %115 = tpu.matmul %114, %2, %cst_49 {dimension_numbers = #tpu.dot_dimension_numbers<[1], [0], [0], [1], [0, 0, 1, 1], [], []>} : vector<8x32xf32>, vector<32x1xf32>, vector<8x1xf32> -> vector<8x1xf32>
    %116 = arith.mulf %114, %114 : vector<8x32xf32>
    %cst_50 = arith.constant dense<0.000000e+00> : vector<8x1xf32>
    %117 = tpu.matmul %116, %2, %cst_50 {dimension_numbers = #tpu.dot_dimension_numbers<[1], [0], [0], [1], [0, 0, 1, 1], [], []>} : vector<8x32xf32>, vector<32x1xf32>, vector<8x1xf32> -> vector<8x1xf32>
    %cst_51 = arith.constant 3.125000e-02 : f32
    %118 = vector.broadcast %cst_51 : f32 to vector<8x1xf32>
    %119 = arith.mulf %115, %118 : vector<8x1xf32>
    %cst_52 = arith.constant 3.125000e-02 : f32
    %120 = vector.broadcast %cst_52 : f32 to vector<8x1xf32>
    %121 = arith.mulf %117, %120 : vector<8x1xf32>
    %122 = arith.mulf %119, %119 : vector<8x1xf32>
    %123 = arith.subf %121, %122 : vector<8x1xf32>
    %124 = vector.broadcast %119 : vector<8x1xf32> to vector<8x32xf32>
    %125 = arith.subf %114, %124 : vector<8x32xf32>
    %cst_53 = arith.constant 9.99999974E-6 : f32
    %126 = vector.broadcast %cst_53 : f32 to vector<8x1xf32>
    %127 = arith.addf %123, %126 : vector<8x1xf32>
    %128 = math.rsqrt %127 : vector<8x1xf32>
    %129 = vector.broadcast %128 : vector<8x1xf32> to vector<8x32xf32>
    %130 = arith.mulf %125, %129 : vector<8x32xf32>
    %131 = vector.broadcast %74 : vector<1x32xf32> to vector<8x32xf32>
    %132 = arith.mulf %130, %131 : vector<8x32xf32>
    %133 = vector.broadcast %75 : vector<1x32xf32> to vector<8x32xf32>
    %134 = arith.addf %132, %133 : vector<8x32xf32>
    %c336 = arith.constant 336 : index
    %c0_54 = arith.constant 0 : index
    %135 = vector.load %arg3[%c336, %c0_54] : memref<376x128xf32, #tpu.memory_space<vmem>>, vector<32x128xf32>
    %c368 = arith.constant 368 : index
    %c0_55 = arith.constant 0 : index
    %136 = vector.load %arg3[%c368, %c0_55] : memref<376x128xf32, #tpu.memory_space<vmem>>, vector<1x128xf32>
    %cst_56 = arith.constant dense<0.000000e+00> : vector<8x128xf32>
    %137 = tpu.matmul %134, %135, %cst_56 {dimension_numbers = #tpu.dot_dimension_numbers<[1], [0], [0], [1], [0, 0, 1, 1], [], []>} : vector<8x32xf32>, vector<32x128xf32>, vector<8x128xf32> -> vector<8x128xf32>
    %138 = vector.broadcast %136 : vector<1x128xf32> to vector<8x128xf32>
    %139 = arith.addf %137, %138 : vector<8x128xf32>
    %c0_57 = arith.constant 0 : index
    %c0_58 = arith.constant 0 : index
    %140 = vector.load %arg4[%c0_57, %c0_58] : memref<8x128xf32, #tpu.memory_space<vmem>>, vector<8x128xf32>
    tpu.vector_store %arg4[%c0_57, %c0_58], %139 {strides = array<i32>} : memref<8x128xf32, #tpu.memory_space<vmem>>, vector<8x128xf32>,
    return
  }
  func.func @transform_0(%arg0: i32) -> (i32, i32) {
    %c0_i32 = arith.constant 0 : i32
    %c0_i32_0 = arith.constant 0 : i32
    return %arg0, %c0_i32 : i32, i32
  }
  func.func @transform_1(%arg0: i32) -> (i32, i32) {
    %c0_i32 = arith.constant 0 : i32
    %c0_i32_0 = arith.constant 0 : i32
    return %arg0, %c0_i32 : i32, i32
  }
  func.func @transform_2(%arg0: i32) -> (i32, i32) {
    %c0_i32 = arith.constant 0 : i32
    %c0_i32_0 = arith.constant 0 : i32
    %c0_i32_1 = arith.constant 0 : i32
    return %c0_i32, %c0_i32_0 : i32, i32
  }
  func.func @transform_3(%arg0: i32) -> (i32, i32) {
    %c0_i32 = arith.constant 0 : i32
    %c0_i32_0 = arith.constant 0 : i32
    return %arg0, %c0_i32 : i32, i32
  }
}

</mosaic_0001>

<bundles_post_ra>
// kernel: tpu_custom_call.1
= control target key start
LH: loop header
LB: loop body
LE: loop exit
PB: predicated region body
PF: predicated region fallthrough
CT: control target
= control target key end

     0   :  { %8 = vsyncpa [#allocation3], 0  ;;  %s2237_s0 = inlined_call_operand.hbm [shape: f32[8,32], index: 0, kind: input, shape index: {}]   ;;  %s2238_s1 = inlined_call_operand.hbm [shape: f32[8,32], index: 1, kind: input, shape index: {}]   ;;  %s2239_s2 = inlined_call_operand.hbm [shape: f32[376,128], index: 2, kind: input, shape index: {}]   ;;  %s2240_s3 = inlined_call_operand.hbm [shape: f32[8,128], index: 3, kind: output, shape index: {}]  }
   0x1   :  { %9 = vsyncpa [#allocation6], 0 }
   0x2   :  { %10 = vsyncpa [#allocation4], 0  ;;  %s2041_s12 = smov [#allocation5]   ;;  %s2042_s14 = smov [#allocation2]  }
   0x3   :  { %s27_s13 = sshll.u32 %s2041_s12, 4  ;;  %s17_s15 = sshll.u32 %s2042_s14, 4  ;;  %s28_s13 = int_to_ptr.vmem [resolvable:$true] %s27_s13  ;;  %s18_s15 = int_to_ptr.vmem [resolvable:$true] %s17_s15 }
   0x4   :  { %s1947_s18 = scalar_lea.hbm %s2238_s1, 128 }
   0x5   :  { %p1948_p0 = scmp.ne.s32.totalorder %s2238_s1, %s1947_s18  ;;  %p1951_p1 = scmp.lt.u32.totalorder %s1947_s18, %s2238_s1 }
   0x7   :  { %p1953_p2 = pnand %p1951_p1, %p1948_p0 }
   0x9   :  { %1956 = shalt.err (!%p1953_p2)
}
   0xa   :  { %s1957_s23 = scalar_lea.vmem %s28_s13, 128  ;;  %p1962_p4 = scmp.lt.s32.totalorder %s28_s13, %s28_s13 }
   0xb   :  { %p1958_p3 = scmp.ne.s32.totalorder %s28_s13, %s1957_s23  ;;  %p1963_p5 = scmp.lt.s32.totalorder %s1957_s23, %s1957_s23 }
   0xd   :  { %p1964_p6 = por %p1963_p5, %p1962_p4 }
   0xf   :  { %p1965_p7 = pnand %p1964_p6, %p1958_p3 }
  0x11   :  { %1968 = shalt.err (!%p1965_p7)
}
  0x12   :  { %30 = dma.hbm_to_vmem [thread:$0]  %s2238_s1, 128, %s28_s13, [#allocation6]  }
  0x13   :  { %s1969_s28 = scalar_lea.hbm %s2237_s0, 128 }
  0x14   :  { %p1970_p8 = scmp.ne.s32.totalorder %s2237_s0, %s1969_s28  ;;  %p1973_p9 = scmp.lt.u32.totalorder %s1969_s28, %s2237_s0 }
  0x16   :  { %p1975_p10 = pnand %p1973_p9, %p1970_p8 }
  0x18   :  { %1978 = shalt.err (!%p1975_p10)
}
  0x19   :  { %s1979_s6 = scalar_lea.vmem %s18_s15, 128  ;;  %p1984_p12 = scmp.lt.s32.totalorder %s18_s15, %s18_s15 }
  0x1a   :  { %p1980_p11 = scmp.ne.s32.totalorder %s18_s15, %s1979_s6  ;;  %p1985_p13 = scmp.lt.s32.totalorder %s1979_s6, %s1979_s6 }
  0x1c   :  { %p1986_p0 = por %p1985_p13, %p1984_p12 }
  0x1e   :  { %p1987_p1 = pnand %p1986_p0, %p1980_p11 }
  0x20   :  { %1990 = shalt.err (!%p1987_p1)
}
  0x21   :  { %20 = dma.hbm_to_vmem [thread:$0]  %s2237_s0, 128, %s18_s15, [#allocation3]  }
  0x22   :  { %s2043_s8 = smov [#allocation7]   ;;  %s1991_s12 = scalar_lea.hbm %s2239_s2, 6016 }
  0x23   :  { %s36_s9 = sshll.u32 %s2043_s8, 4  ;;  %p1992_p2 = scmp.ne.s32.totalorder %s2239_s2, %s1991_s12  ;;  %s37_s9 = int_to_ptr.vmem [resolvable:$true] %s36_s9 }
  0x24   :  { %p1995_p3 = scmp.lt.u32.totalorder %s1991_s12, %s2239_s2 }
  0x26   :  { %p1997_p4 = pnand %p1995_p3, %p1992_p2 }
  0x28   :  { %2000 = shalt.err (!%p1997_p4)
}
  0x29   :  { %s2001_s18 = scalar_lea.vmem %s37_s9, 6016  ;;  %p2006_p6 = scmp.lt.s32.totalorder %s37_s9, %s37_s9 }
  0x2a   :  { %p2002_p5 = scmp.ne.s32.totalorder %s37_s9, %s2001_s18  ;;  %p2007_p7 = scmp.lt.s32.totalorder %s2001_s18, %s2001_s18 }
  0x2c   :  { %p2008_p8 = por %p2007_p7, %p2006_p6 }
  0x2e   :  { %p2009_p9 = pnand %p2008_p8, %p2002_p5 }
  0x30   :  { %2012 = shalt.err (!%p2009_p9)
}
  0x31   :  { %s2044_s0 = smov 128   ;;  %s2045_s15 = smov 8  }
  0x32   :  { %42 = dma.hbm_to_vmem [thread:$0]  %s2239_s2, 6016, %s37_s9, [#allocation6], %s2044_s0, %s2044_s0, %s2045_s15  }
  0x33   :  { %2035 = dma.done.wait [#allocation3], 128  }
  0x34   :  { %2036 = vsyncadd [#allocation3], 4294967168 }
  0x35   :  { %2037 = dma.done.wait [#allocation6], 6144  }
  0x36   :  { %2038 = vsyncadd [#allocation6], 4294961152  ;;  %v2046_v0 = vmov 0.0|0.0   ;;  %vm2047_vm0 = vmmov 0   ;;  %v2048_v1 = vmov 0.0   ;;  %v58_v2 = vld [vmem:[#allocation7 + $0x20] sm:$0xff] }
  0x37   :  { %1828 = vmatprep.subr.bf16.mxu0 %v2046_v0  ;;  %1834 = vmatprep.subr.bf16.mxu1 %v2046_v0  ;;  %v59_v3 = vld [vmem:[#allocation7 + $0x28] sm:$0xff]  ;;  %v54_v4 = vld [vmem:[#allocation7] sm:$0xff]  ;;  %v60_v7 = vld [vmem:[#allocation7 + $0x30] sm:$0xff]  ;;  %vm79_vm1 = vcmask 261120   ;;  %v2049_v16 = vmov 1.0|1.0  }
  0x38   :  { %1633 = vmatprep.mubr.msk.f32.mxu0 %vm2047_vm0, %v2048_v1  ;;  %1644 = vmatprep.mubr.msk.f32.mxu1 %vm2047_vm0, %v2048_v1  ;;  %v1829_v5 = vpack.c.bf16 %v59_v3, %v58_v2  ;;  %v55_v6 = vld [vmem:[#allocation7 + $0x8] sm:$0xff]  ;;  %v61_v8 = vld [vmem:[#allocation7 + $0x38] sm:$0xff]  ;;  %v56_v10 = vld [vmem:[#allocation7 + $0x10] sm:$0xff]  ;;  %v2050_v27 = vmov 0   ;;  %vm490_vm2 = vcmask 523264   ;;  %s2051_s2 = smov [#allocation8]  }
  0x39   :  { %v1835_v9 = vpack.c.bf16 %v55_v6, %v54_v4  ;;  %v57_v11 = vld [vmem:[#allocation7 + $0x18] sm:$0xff]  ;;  %v1832_v12 = vpack.c.bf16 %v61_v8, %v60_v7  ;;  %v52_v15 = vld [vmem:[#allocation2] sm:$0xff]  ;;  %v1506_v18 = vld [vmem:[#allocation7 + $0xa0] ss:$0 sm:$0xff]  ;;  %1937 = vset.pattern.permute.xlu0 %v2050_v27  ;;  %1938 = vset.pattern.permute.xlu1 %v2050_v27  ;;  %s1494_s21 = sshll.u32 %s2051_s2, 4  ;;  %s1495_s21 = int_to_ptr.vmem [resolvable:$true] %s1494_s21 }
  0x3a   :  { %1830 = vmatpush3.bf16.msra.mxu0 %v1829_v5  ;;  %v1838_v13 = vpack.c.bf16 %v57_v11, %v56_v10  ;;  %v2116_v14 = vld [vmem:[#allocation5] sm:$0xff]  ;;  %v62_v35 = vld [vmem:[#allocation7 + $0x40] sm:$0xff]  ;;  %v63_v36 = vld [vmem:[#allocation7 + $0x48] sm:$0xff]  ;;  %s2013_s22 = scalar_lea.vmem %s1495_s21, 128  ;;  %p2018_p11 = scmp.lt.s32.totalorder %s1495_s21, %s1495_s21 }
  0x3b   :  { %1836 = vmatpush3.bf16.msra.mxu1 %v1835_v9  ;;  %1831 = vmatprep.subr.bf16.mxu0 %v2046_v0  ;;  %v1849_v37 = vpack.c.bf16 %v63_v36, %v62_v35  ;;  %v64_v41 = vld [vmem:[#allocation7 + $0x50] sm:$0xff]  ;;  %v65_v42 = vld [vmem:[#allocation7 + $0x58] sm:$0xff]  ;;  %v66_v44 = vld [vmem:[#allocation7 + $0x60] sm:$0xff]  ;;  %p2014_p10 = scmp.ne.s32.totalorder %s1495_s21, %s2013_s22  ;;  %p2019_p12 = scmp.lt.s32.totalorder %s2013_s22, %s2013_s22 }
  0x3c   :  { %1837 = vmatprep.subr.bf16.mxu1 %v2046_v0  ;;  %v1852_v43 = vpack.c.bf16 %v65_v42, %v64_v41  ;;  %v67_v45 = vld [vmem:[#allocation7 + $0x68] sm:$0xff]  ;;  %v68_v46 = vld [vmem:[#allocation7 + $0x70] sm:$0xff]  ;;  %v69_v48 = vld [vmem:[#allocation7 + $0x78] sm:$0xff] }
  0x3d   :  { %v1855_v47 = vpack.c.bf16 %v67_v45, %v66_v44  ;;  %v1858_v49 = vpack.c.bf16 %v69_v48, %v68_v46  ;;  %v70_v50 = vld [vmem:[#allocation7 + $0x80] sm:$0xff]  ;;  %v71_v51 = vld [vmem:[#allocation7 + $0x88] sm:$0xff]  ;;  %v72_v61 = vld [vmem:[#allocation7 + $0x90] sm:$0xff]  ;;  %p2020_p13 = por %p2019_p12, %p2018_p11 }
  0x3e   :  { %1833 = vmatpush3.bf16.msra.mxu0 %v1832_v12  ;;  %v1861_v52 = vpack.c.bf16 %v71_v51, %v70_v50  ;;  %v2146_v55 = vld [vmem:[#allocation7 + $0xa1] ss:$0 sm:$0xff]  ;;  %v2148_v58 = vld [vmem:[#allocation7 + $0xa2] ss:$0 sm:$0xff]  ;;  %v73_v62 = vld [vmem:[#allocation7 + $0x98] sm:$0xff] }
  0x3f   :  { %1839 = vmatpush3.bf16.msra.mxu1 %v1838_v13  ;;  %1840 = vmatprep.subr.bf16.mxu0 %v2046_v0  ;;  %v1864_v63 = vpack.c.bf16 %v73_v62, %v72_v61  ;;  %v1511_v2 = vld [vmem:[#allocation7 + $0xa3] ss:$0 sm:$0xff]  ;;  %v1513_v7 = vld [vmem:[#allocation7 + $0xa4] ss:$0 sm:$0xff]  ;;  %v1519_v44 = vld [vmem:[#allocation7 + $0x148] ss:$0 sm:$0xff]  ;;  %p2021_p0 = pnand %p2020_p13, %p2014_p10 }
  0x40   :  { %1844 = vmatprep.subr.bf16.mxu1 %v2046_v0  ;;  %v735_v35 = vld [vmem:[#allocation7 + $0xc0] sm:$0xff] }
  0x41   :  { %1634 = vmatmul.mubr.msk.f32.vlgmr.msra.gmra.mrb[0].mxu0 %vm79_vm1, %v2116_v14 }
  0x42   :  { %1645 = vmatmul.mubr.msk.f32.vlgmr.msra.gmra.mrb[0].mxu1 %vm79_vm1, %v52_v15  ;;  %1655 = vmatprep.mubr.msk.f32.mxu0 %vm2047_vm0, %v2048_v1 }
  0x43   :  { %1666 = vmatprep.mubr.msk.f32.mxu1 %vm2047_vm0, %v2048_v1  ;;  %1841 = vmatpush3.bf16.msra.mxu0 %v2049_v16 }
  0x44   :  { %1845 = vmatpush3.bf16.msra.mxu1 %v2049_v16  ;;  %1842 = vmatprep.subr.bf16.mxu0 %v2046_v0 }
  0x45   :  { %1846 = vmatprep.subr.bf16.mxu1 %v2046_v0 }
  0x47   :  { %1843 = vmatpush3.bf16.msra.mxu0 %v2049_v16 }
  0x48   :  { %1847 = vmatpush3.bf16.msra.mxu1 %v2049_v16  ;;  %1848 = vmatprep.subr.bf16.mxu0 %v2046_v0 }
  0x49   :  { %1854 = vmatprep.subr.bf16.mxu1 %v2046_v0 }
 0x114   :  { %v149_v17 = vpop.f32.mrb[0].mxu0 }
 0x115   :  { %v222_v19 = vpop.f32.mrb[0].mxu1  ;;  %v1635_v20 = vpop.f32.mrb[1].mxu0 }
 0x116   :  { %v223_v21 = vadd.f32 %v222_v19, %v149_v17  ;;  %v1646_v22 = vpop.f32.mrb[1].mxu1  ;;  %v737_v19 = vld [vmem:[#allocation7 + $0xd0] sm:$0xff]  ;;  %v732_v20 = vld [vmem:[#allocation7 + $0xa8] sm:$0xff] }
 0x117   :  { %v733_v22 = vld [vmem:[#allocation7 + $0xb0] sm:$0xff] }
 0x118   :  { %v230_v23 = vadd.f32 %v1506_v18, %v223_v21  ;;  %v736_v18 = vld [vmem:[#allocation7 + $0xc8] sm:$0xff] }
 0x119   :  { %v1875_v21 = vpack.c.bf16 %v737_v19, %v736_v18  ;;  %v1522_v19 = vld [vmem:[#allocation7 + $0x149] ss:$0 sm:$0xff] }
 0x11a   :  { %v231_v24 = vmax.f32 %v230_v23, 0.0  ;;  %v1881_v23 = vpack.c.bf16 %v733_v22, %v732_v20  ;;  %v1523_v22 = vld [vmem:[#allocation7 + $0x14a] ss:$0 sm:$0xff] }
 0x11c   :  { %v232_v25 = vadd.f32 %v231_v24, %v52_v15 }
 0x11e   :  { %v306_v26 = vmul.f32 %v232_v25, %v232_v25  ;;  %1656 = vmatmul.mubr.msk.f32.vlgmr.msra.gmra.mrb[2].mxu0 %vm79_vm1, %v232_v25 }
 0x11f   :  { %1677 = vmatprep.mubr.msk.f32.mxu0 %vm2047_vm0, %v2048_v1  ;;  %1850 = vmatpush3.bf16.msra.mxu0 %v1849_v37 }
 0x120   :  { %1667 = vmatmul.mubr.msk.f32.vlgmr.msra.gmra.mrb[2].mxu1 %vm79_vm1, %v306_v26  ;;  %1851 = vmatprep.subr.bf16.mxu0 %v2046_v0 }
 0x121   :  { %1696 = vmatprep.mubr.msk.f32.mxu1 %vm2047_vm0, %v2048_v1  ;;  %1856 = vmatpush3.bf16.msra.mxu1 %v1855_v47 }
 0x122   :  { %1857 = vmatprep.subr.bf16.mxu1 %v2046_v0 }
 0x123   :  { %1853 = vmatpush3.bf16.msra.mxu0 %v1852_v43 }
 0x124   :  { %1866 = vmatprep.subr.bf16.mxu0 %v2046_v0 }
 0x125   :  { %1859 = vmatpush3.bf16.msra.mxu1 %v1858_v49 }
 0x126   :  { %1860 = vmatprep.subr.bf16.mxu1 %v2046_v0 }
 0x129   :  { %1862 = vmatpush3.bf16.msra.mxu1 %v1861_v52 }
 0x12a   :  { %1863 = vmatprep.subr.bf16.mxu1 %v2046_v0 }
 0x12d   :  { %1865 = vmatpush3.bf16.msra.mxu1 %v1864_v63 }
 0x12e   :  { %1874 = vmatprep.subr.bf16.mxu1 %v2046_v0 }
 0x1f1   :  { %v302_v28 = vpop.f32.mrb[2].mxu0 }
 0x1f2   :  { %v380_v29 = vmul.f32 0.03125, %v302_v28  ;;  %v1657_v30 = vpop.f32.mrb[3].mxu0 }
 0x1f3   :  { %v376_v31 = vpop.f32.mrb[2].mxu1 }
 0x1f4   :  { %v382_v32 = vmul.f32 %v380_v29, %v380_v29  ;;  %v381_v33 = vmul.f32 0.03125, %v376_v31  ;;  %386 = vperm.xlu0 %1937, %v380_v29   ;;  %v1668_v34 = vpop.f32.mrb[3].mxu1  ;;  %v738_v31 = vld [vmem:[#allocation7 + $0xd8] sm:$0xff] }
 0x1f5   :  { %v734_v34 = vld [vmem:[#allocation7 + $0xb8] sm:$0xff] }
 0x1f6   :  { %v383_v38 = vsub.f32 %v381_v33, %v382_v32  ;;  %v739_v32 = vld [vmem:[#allocation7 + $0xe0] sm:$0xff]  ;;  %v1884_v36 = vpack.c.bf16 %v735_v35, %v734_v34 }
 0x1f7   :  { %v1878_v33 = vpack.c.bf16 %v739_v32, %v738_v31 }
 0x1f8   :  { %v390_v39 = vadd.f32 1e-05, %v383_v38 }
 0x1fa   :  { %1939 = vrsqrt.f32 %v390_v39 }
 0x204   :  { %v1940_v40 = vpop.eup %1939 }
 0x205   :  { %394 = vperm.xlu0 %1937, %v1940_v40  }
 0x273   :  { %v387_v53 = vpop.permute.xlu0 %386 }
 0x274   :  { %v389_v54 = vsub.f32 %v232_v25, %v387_v53 }
 0x284   :  { %v395_v56 = vpop.permute.xlu0 %394 }
 0x285   :  { %v397_v57 = vmul.f32 %v395_v56, %v389_v54 }
 0x287   :  { %v402_v59 = vmul.f32 %v2146_v55, %v397_v57 }
 0x289   :  { %v407_v60 = vadd.f32 %v2148_v58, %v402_v59  ;;  %v740_v59 = vld [vmem:[#allocation7 + $0xe8] sm:$0xff] }
 0x28b   :  { %1678 = vmatmul.mubr.msk.f32.vlgmr.msra.gmra.mrb[4].mxu0 %vm79_vm1, %v407_v60 }
 0x28c   :  { %1867 = vmatpush3.bf16.msra.mxu0 %v2049_v16  ;;  %1707 = vmatprep.mubr.msk.f32.mxu0 %vm2047_vm0, %v2048_v1 }
 0x28d   :  { %1868 = vmatprep.subr.bf16.mxu0 %v2046_v0 }
 0x290   :  { %1869 = vmatpush3.bf16.msra.mxu0 %v2049_v16 }
 0x291   :  { %1870 = vmatprep.subr.bf16.mxu0 %v2046_v0 }
 0x35e   :  { %v481_v3 = vpop.f32.mrb[4].mxu0 }
 0x35f   :  { %v482_v4 = vadd.f32 %v1511_v2, %v481_v3  ;;  %v1679_v5 = vpop.f32.mrb[5].mxu0  ;;  %v742_v3 = vld [vmem:[#allocation7 + $0xf8] sm:$0xff] }
 0x361   :  { %v485_v6 = vmax.f32 %v482_v4, 0.0  ;;  %v743_v4 = vld [vmem:[#allocation7 + $0x100] sm:$0xff] }
 0x362   :  { %v1898_v5 = vpack.c.bf16 %v743_v4, %v742_v3 }
 0x363   :  { %1697 = vmatmul.mubr.msk.f32.vlgmr.msra.gmra.mrb[4].mxu1 %vm490_vm2, %v485_v6  ;;  %v744_v6 = vld [vmem:[#allocation7 + $0x108] sm:$0xff] }
 0x364   :  { %1729 = vmatprep.mubr.msk.f32.mxu1 %vm2047_vm0, %v2048_v1  ;;  %1876 = vmatpush3.bf16.msra.mxu1 %v1875_v21 }
 0x365   :  { %1877 = vmatprep.subr.bf16.mxu1 %v2046_v0 }
 0x368   :  { %1879 = vmatpush3.bf16.msra.mxu1 %v1878_v33  ;;  %v1526_v33 = vld [vmem:[#allocation7 + $0x14c] ss:$0 sm:$0xff] }
 0x369   :  { %1886 = vmatprep.subr.bf16.mxu1 %v2046_v0 }
 0x36b   :  { %1730 = vmatmul.mubr.msk.f32.vlgmr.msra.gmra.mrb[6].mxu1 %vm79_vm1, %v2116_v14 }
 0x36c   :  { %1887 = vmatpush3.bf16.msra.mxu1 %v2049_v16  ;;  %1751 = vmatprep.mubr.msk.f32.mxu1 %vm2047_vm0, %v2048_v1 }
 0x36d   :  { %1888 = vmatprep.subr.bf16.mxu1 %v2046_v0 }
 0x370   :  { %1889 = vmatpush3.bf16.msra.mxu1 %v2049_v16 }
 0x371   :  { %1894 = vmatprep.subr.bf16.mxu1 %v2046_v0 }
 0x436   :  { %v560_v8 = vpop.f32.mrb[4].mxu1 }
 0x437   :  { %v561_v9 = vadd.f32 %v1513_v7, %v560_v8  ;;  %v1698_v10 = vpop.f32.mrb[5].mxu1  ;;  %v745_v7 = vld [vmem:[#allocation7 + $0x110] sm:$0xff]  ;;  %v746_v8 = vld [vmem:[#allocation7 + $0x118] sm:$0xff] }
 0x438   :  { %v747_v10 = vld [vmem:[#allocation7 + $0x120] sm:$0xff] }
 0x439   :  { %v564_v11 = vadd.f32 %v561_v9, %v407_v60  ;;  %v741_v60 = vld [vmem:[#allocation7 + $0xf0] sm:$0xff]  ;;  %v1901_v9 = vpack.c.bf16 %v745_v7, %v744_v6 }
 0x43a   :  { %v1895_v61 = vpack.c.bf16 %v741_v60, %v740_v59 }
 0x43b   :  { %1708 = vmatmul.mubr.msk.f32.vlgmr.msra.gmra.mrb[6].mxu0 %vm79_vm1, %v564_v11  ;;  %v638_v12 = vmul.f32 %v564_v11, %v564_v11 }
 0x43c   :  { %1871 = vmatpush3.bf16.msra.mxu0 %v2049_v16  ;;  %1718 = vmatprep.mubr.msk.f32.mxu0 %vm2047_vm0, %v2048_v1 }
 0x43d   :  { %1872 = vmatprep.subr.bf16.mxu0 %v2046_v0 }
 0x43e   :  { %v823_v14 = vpop.f32.mrb[6].mxu1 }
 0x43f   :  { %v1731_v43 = vpop.f32.mrb[7].mxu1 }
 0x440   :  { %1873 = vmatpush3.bf16.msra.mxu0 %v2049_v16 }
 0x441   :  { %1880 = vmatprep.subr.bf16.mxu0 %v2046_v0 }
 0x443   :  { %1719 = vmatmul.mubr.msk.f32.vlgmr.msra.gmra.mrb[8].mxu0 %vm79_vm1, %v638_v12  ;;  %v748_v12 = vld [vmem:[#allocation7 + $0x128] sm:$0xff] }
 0x444   :  { %1740 = vmatprep.mubr.msk.f32.mxu0 %vm2047_vm0, %v2048_v1  ;;  %1882 = vmatpush3.bf16.msra.mxu0 %v1881_v23 }
 0x445   :  { %1883 = vmatprep.subr.bf16.mxu0 %v2046_v0 }
 0x448   :  { %1885 = vmatpush3.bf16.msra.mxu0 %v1884_v36 }
 0x449   :  { %1890 = vmatprep.subr.bf16.mxu0 %v2046_v0 }
 0x50e   :  { %v634_v13 = vpop.f32.mrb[6].mxu0 }
 0x50f   :  { %v712_v15 = vmul.f32 0.03125, %v634_v13  ;;  %v1709_v17 = vpop.f32.mrb[7].mxu0  ;;  %v749_v13 = vld [vmem:[#allocation7 + $0x130] sm:$0xff] }
 0x511   :  { %718 = vperm.xlu1 %1938, %v712_v15   ;;  %v714_v25 = vmul.f32 %v712_v15, %v712_v15  ;;  %v1907_v15 = vpack.c.bf16 %v749_v13, %v748_v12 }
 0x516   :  { %v708_v24 = vpop.f32.mrb[8].mxu0 }
 0x517   :  { %v713_v26 = vmul.f32 0.03125, %v708_v24  ;;  %v1720_v27 = vpop.f32.mrb[9].mxu0 }
 0x519   :  { %v715_v28 = vsub.f32 %v713_v26, %v714_v25  ;;  %v750_v25 = vld [vmem:[#allocation7 + $0x138] sm:$0xff]  ;;  %v751_v26 = vld [vmem:[#allocation7 + $0x140] sm:$0xff] }
 0x51a   :  { %v1910_v27 = vpack.c.bf16 %v751_v26, %v750_v25 }
 0x51b   :  { %v722_v29 = vadd.f32 1e-05, %v715_v28  ;;  %v1524_v28 = vld [vmem:[#allocation7 + $0x14b] ss:$0 sm:$0xff] }
 0x51d   :  { %1941 = vrsqrt.f32 %v722_v29 }
 0x527   :  { %v1942_v30 = vpop.eup %1941 }
 0x528   :  { %726 = vperm.xlu1 %1938, %v1942_v30  }
 0x590   :  { %v719_v37 = vpop.permute.xlu1 %718 }
 0x591   :  { %v721_v38 = vsub.f32 %v564_v11, %v719_v37  ;;  %v1904_v11 = vpack.c.bf16 %v747_v10, %v746_v8 }
 0x5a7   :  { %v727_v39 = vpop.permute.xlu1 %726 }
 0x5a8   :  { %v729_v40 = vmul.f32 %v727_v39, %v721_v38 }
 0x5aa   :  { %v730_v41 = vmul.f32 %v2146_v55, %v729_v40 }
 0x5ac   :  { %v731_v42 = vadd.f32 %v2148_v58, %v730_v41 }
 0x5ae   :  { %1741 = vmatmul.mubr.msk.f32.vlgmr.msra.gmra.mrb[10].mxu0 %vm79_vm1, %v731_v42 }
 0x5af   :  { %1891 = vmatpush3.bf16.msra.mxu0 %v2049_v16  ;;  %1762 = vmatprep.mubr.msk.f32.mxu0 %vm2047_vm0, %v2048_v1 }
 0x5b0   :  { %1892 = vmatprep.subr.bf16.mxu0 %v2046_v0 }
 0x5b3   :  { %1893 = vmatpush3.bf16.msra.mxu0 %v2049_v16 }
 0x5b4   :  { %1900 = vmatprep.subr.bf16.mxu0 %v2046_v0 }
 0x681   :  { %v896_v45 = vpop.f32.mrb[10].mxu0 }
 0x682   :  { %v897_v46 = vadd.f32 %v896_v45, %v823_v14  ;;  %v1742_v47 = vpop.f32.mrb[11].mxu0  ;;  %v1406_v14 = vld [vmem:[#allocation7 + $0x158] sm:$0xff] }
 0x684   :  { %v904_v48 = vadd.f32 %v1519_v44, %v897_v46 }
 0x686   :  { %v905_v49 = vmax.f32 %v904_v48, 0.0 }
 0x688   :  { %v906_v50 = vadd.f32 %v905_v49, %v731_v42  ;;  %v1405_v42 = vld [vmem:[#allocation7 + $0x150] sm:$0xff]  ;;  %v1407_v49 = vld [vmem:[#allocation7 + $0x160] sm:$0xff] }
 0x689   :  { %v1921_v43 = vpack.c.bf16 %v1406_v14, %v1405_v42 }
 0x68a   :  { %v980_v51 = vmul.f32 %v906_v50, %v906_v50  ;;  %1752 = vmatmul.mubr.msk.f32.vlgmr.msra.gmra.mrb[8].mxu1 %vm79_vm1, %v906_v50 }
 0x68b   :  { %1773 = vmatprep.mubr.msk.f32.mxu1 %vm2047_vm0, %v2048_v1  ;;  %1896 = vmatpush3.bf16.msra.mxu1 %v1895_v61 }
 0x68c   :  { %1763 = vmatmul.mubr.msk.f32.vlgmr.msra.gmra.mrb[12].mxu0 %vm79_vm1, %v980_v51  ;;  %1897 = vmatprep.subr.bf16.mxu1 %v2046_v0 }
 0x68d   :  { %1792 = vmatprep.mubr.msk.f32.mxu0 %vm2047_vm0, %v2048_v1  ;;  %1902 = vmatpush3.bf16.msra.mxu0 %v1901_v9 }
 0x68e   :  { %1903 = vmatprep.subr.bf16.mxu0 %v2046_v0 }
 0x68f   :  { %1899 = vmatpush3.bf16.msra.mxu1 %v1898_v5 }
 0x690   :  { %1912 = vmatprep.subr.bf16.mxu1 %v2046_v0 }
 0x691   :  { %1905 = vmatpush3.bf16.msra.mxu0 %v1904_v11 }
 0x692   :  { %1906 = vmatprep.subr.bf16.mxu0 %v2046_v0 }
 0x695   :  { %1908 = vmatpush3.bf16.msra.mxu0 %v1907_v15 }
 0x696   :  { %1909 = vmatprep.subr.bf16.mxu0 %v2046_v0 }
 0x699   :  { %1911 = vmatpush3.bf16.msra.mxu0 %v1910_v27 }
 0x69a   :  { %1920 = vmatprep.subr.bf16.mxu0 %v2046_v0 }
 0x75d   :  { %v976_v52 = vpop.f32.mrb[8].mxu1 }
 0x75e   :  { %v1054_v53 = vmul.f32 0.03125, %v976_v52  ;;  %v1753_v54 = vpop.f32.mrb[9].mxu1 }
 0x75f   :  { %v1050_v55 = vpop.f32.mrb[12].mxu0 }
 0x760   :  { %v1056_v56 = vmul.f32 %v1054_v53, %v1054_v53  ;;  %v1055_v57 = vmul.f32 0.03125, %v1050_v55  ;;  %v1764_v58 = vpop.f32.mrb[13].mxu0  ;;  %1060 = vperm.xlu0 %1937, %v1054_v53  }
 0x762   :  { %v1057_v62 = vsub.f32 %v1055_v57, %v1056_v56 }
 0x764   :  { %v1064_v63 = vadd.f32 1e-05, %v1057_v62 }
 0x766   :  { %1943 = vrsqrt.f32 %v1064_v63 }
 0x770   :  { %v1944_v2 = vpop.eup %1943 }
 0x771   :  { %1068 = vperm.xlu1 %1938, %v1944_v2  }
 0x7df   :  { %v1061_v17 = vpop.permute.xlu0 %1060 }
 0x7e0   :  { %v1063_v18 = vsub.f32 %v906_v50, %v1061_v17  ;;  %v1408_v50 = vld [vmem:[#allocation7 + $0x168] sm:$0xff] }
 0x7e1   :  { %v1924_v51 = vpack.c.bf16 %v1408_v50, %v1407_v49 }
 0x7f0   :  { %v1069_v20 = vpop.permute.xlu1 %1068 }
 0x7f1   :  { %v1071_v21 = vmul.f32 %v1069_v20, %v1063_v18 }
 0x7f3   :  { %v1076_v23 = vmul.f32 %v1522_v19, %v1071_v21 }
 0x7f5   :  { %v1081_v24 = vadd.f32 %v1523_v22, %v1076_v23 }
 0x7f7   :  { %1774 = vmatmul.mubr.msk.f32.vlgmr.msra.gmra.mrb[10].mxu1 %vm79_vm1, %v1081_v24 }
 0x7f8   :  { %1913 = vmatpush3.bf16.msra.mxu1 %v2049_v16  ;;  %1803 = vmatprep.mubr.msk.f32.mxu1 %vm2047_vm0, %v2048_v1 }
 0x7f9   :  { %1914 = vmatprep.subr.bf16.mxu1 %v2046_v0 }
 0x7fc   :  { %1915 = vmatpush3.bf16.msra.mxu1 %v2049_v16 }
 0x7fd   :  { %1916 = vmatprep.subr.bf16.mxu1 %v2046_v0 }
 0x8ca   :  { %v1155_v29 = vpop.f32.mrb[10].mxu1 }
 0x8cb   :  { %v1156_v30 = vadd.f32 %v1524_v28, %v1155_v29  ;;  %v1775_v31 = vpop.f32.mrb[11].mxu1 }
 0x8cd   :  { %v1159_v32 = vmax.f32 %v1156_v30, 0.0 }
 0x8cf   :  { %1793 = vmatmul.mubr.msk.f32.vlgmr.msra.gmra.mrb[14].mxu0 %vm490_vm2, %v1159_v32 }
 0x8d0   :  { %1825 = vmatprep.mubr.msk.f32.mxu0 %vm2047_vm0, %v2048_v1  ;;  %1922 = vmatpush3.bf16.msra.mxu0 %v1921_v43 }
 0x8d1   :  { %1923 = vmatprep.subr.bf16.mxu0 %v2046_v0 }
 0x8d4   :  { %1925 = vmatpush3.bf16.msra.mxu0 %v1924_v51 }
 0x9a2   :  { %v1233_v34 = vpop.f32.mrb[14].mxu0 }
 0x9a3   :  { %v1234_v35 = vadd.f32 %v1526_v33, %v1233_v34  ;;  %v1794_v36 = vpop.f32.mrb[15].mxu0 }
 0x9a5   :  { %v1237_v37 = vadd.f32 %v1234_v35, %v1081_v24 }
 0x9a7   :  { %1804 = vmatmul.mubr.msk.f32.vlgmr.msra.gmra.mrb[12].mxu1 %vm79_vm1, %v1237_v37  ;;  %v1311_v38 = vmul.f32 %v1237_v37, %v1237_v37 }
 0x9a8   :  { %1917 = vmatpush3.bf16.msra.mxu1 %v2049_v16  ;;  %1814 = vmatprep.mubr.msk.f32.mxu1 %vm2047_vm0, %v2048_v1 }
 0x9a9   :  { %1918 = vmatprep.subr.bf16.mxu1 %v2046_v0  ;;  %v1530_v0 = vld [vmem:[#allocation7 + $0x170] ss:$0 sm:$0xff] }
 0x9ac   :  { %1919 = vmatpush3.bf16.msra.mxu1 %v2049_v16 }
 0x9af   :  { %1815 = vmatmul.mubr.msk.f32.vlgmr.msra.gmra.mrb[14].mxu1 %vm79_vm1, %v1311_v38 }
 0xa7a   :  { %v1307_v39 = vpop.f32.mrb[12].mxu1 }
 0xa7b   :  { %v1385_v40 = vmul.f32 0.03125, %v1307_v39  ;;  %v1805_v41 = vpop.f32.mrb[13].mxu1 }
 0xa7d   :  { %1391 = vperm.xlu0 %1937, %v1385_v40   ;;  %v1387_v45 = vmul.f32 %v1385_v40, %v1385_v40 }
 0xa82   :  { %v1381_v44 = vpop.f32.mrb[14].mxu1 }
 0xa83   :  { %v1386_v1 = vmul.f32 0.03125, %v1381_v44  ;;  %v1816_v46 = vpop.f32.mrb[15].mxu1 }
 0xa85   :  { %v1388_v47 = vsub.f32 %v1386_v1, %v1387_v45 }
 0xa87   :  { %v1395_v48 = vadd.f32 1e-05, %v1388_v47 }
 0xa89   :  { %1945 = vrsqrt.f32 %v1395_v48 }
 0xa93   :  { %v1946_v16 = vpop.eup %1945 }
 0xa94   :  { %1399 = vperm.xlu1 %1938, %v1946_v16  }
 0xafc   :  { %v1392_v52 = vpop.permute.xlu0 %1391 }
 0xafd   :  { %v1394_v53 = vsub.f32 %v1237_v37, %v1392_v52 }
 0xb13   :  { %v1400_v54 = vpop.permute.xlu1 %1399 }
 0xb14   :  { %v1402_v55 = vmul.f32 %v1400_v54, %v1394_v53 }
 0xb16   :  { %v1403_v56 = vmul.f32 %v1522_v19, %v1402_v55 }
 0xb18   :  { %v1404_v57 = vadd.f32 %v1523_v22, %v1403_v56 }
 0xb1a   :  { %1826 = vmatmul.mubr.msk.f32.vlgmr.msra.gmra.mrb[16].mxu0 %vm79_vm1, %v1404_v57 }
 0xbed   :  { %v1483_v58 = vpop.f32.mrb[16].mxu0 }
 0xbee   :  { %v1484_v59 = vadd.f32 %v1530_v0, %v1483_v58  ;;  %v1827_v60 = vpop.f32.mrb[17].mxu0 }
 0xbf0   :  { %1487 = vst [vmem:[#allocation8] sm:$0xff] %v1484_v59 }
 0xbf1   :  { %2024 = shalt.err (!%p2021_p0)
}
 0xbf2   :  { %s2025_s25 = scalar_lea.hbm %s2240_s3, 128 }
 0xbf3   :  { %p2026_p1 = scmp.ne.s32.totalorder %s2240_s3, %s2025_s25  ;;  %p2029_p2 = scmp.lt.u32.totalorder %s2025_s25, %s2240_s3 }
 0xbf5   :  { %p2031_p3 = pnand %p2029_p2, %p2026_p1 }
 0xbf7   :  { %2034 = shalt.err (!%p2031_p3)
}
 0xbf8   :  { %1497 = dma.vmem_to_hbm [thread:$0]  %s1495_s21, 128, %s2240_s3, [#allocation4]  }
 0xbf9   :  { %2039 = dma.done.wait [#allocation4], 128  }
 0xbfa   :  { %2040 = vsyncadd [#allocation4], 4294967168 }
 0xbfb   :  { %1501 = vsyncpa [#allocation3], 1 }
 0xbfc   :  { %1502 = vsyncpa [#allocation6], 1 }
 0xbfd   :  { %1503 = vsyncpa [#allocation4], 1 }

</bundles_post_ra>
